<compile_context>
chip_gen: v7x
topology: tpu7x:2x2x1
jax: 0.10.0
libtpu: 0.0.40
codegen_flags: <defaults>
</compile_context>

<pallas_src>
import functools

import numpy as np
import jax
import jax.numpy as jnp
from jax import lax
from jax.experimental import pallas as pl
from jax.experimental.pallas import tpu as pltpu

K = 3  # number of kept elements along the pooled dim (trace-time constant)


def _choose_blocks(B, T, H, in_itemsize, cmp_itemsize):
    """Pick (outer block batch bt, inner chunk sub_bt); bt is a multiple of sub_bt."""
    row_cmp = T * H * cmp_itemsize   # bytes of one element's live working set
    row_in = T * H * in_itemsize     # bytes of one element in the input block
    half_b = -(-B // 2)              # ceil(B/2): keep >= 2 grid blocks (2 TCs on v7x)

    # Inner chunk: keep the (sub_bt, T, H) live arrays around <= ~32 vregs (128 KiB)
    # so the batched selection passes don't spill.
    sub_bt = max(1, (128 * 1024) // max(1, row_cmp))
    sub_bt = min(sub_bt, half_b, B)

    # Outer block: ~1 MiB of input per grid step, capped so the double-buffered
    # input block stays <= ~8 MiB (inside the scoped-VMEM limit on v5e/v6e/v7x)
    # and the grid keeps >= 2 blocks.
    n_chunks = max(1, (1 << 20) // max(1, sub_bt * row_in))
    n_chunks = min(n_chunks, max(1, (8 << 20) // max(1, 2 * sub_bt * row_in)))
    n_chunks = min(n_chunks, max(1, half_b // sub_bt))
    return sub_bt * n_chunks, sub_bt


def _kmax_kernel(x_ref, o_ref, *, k, sub_bt, cmp_dtype):
    """x_ref: (bt, T, H) VMEM tile -> o_ref: (bt, k, H) VMEM tile."""
    bt, T, H = x_ref.shape
    n_chunks = bt // sub_bt

    # Hoisted once per grid step (JAX does not CSE broadcast_in_dim).
    iota_t = lax.broadcasted_iota(jnp.int32, (sub_bt, T, H), 1)
    sentinel = jnp.asarray(-jnp.inf, dtype=cmp_dtype)

    def process(start):
        xm = x_ref[pl.ds(start, sub_bt)].astype(cmp_dtype)        # (sub_bt, T, H)

        # --- K selection passes. Each pass's per-lane max IS the selected value,
        # so no output gather over (T, H) is needed afterwards.
        vals, idxs = [], []
        for _ in range(k):
            m = jnp.max(xm, axis=1, keepdims=True)                              # (sub_bt,1,H)
            cand = xm == m                                                      # (sub_bt,T,H)
            idx = jnp.min(jnp.where(cand, iota_t, T), axis=1, keepdims=True)    # (sub_bt,1,H)
            xm = jnp.where(iota_t == idx, sentinel, xm)                         # mask the pick
            vals.append(m)
            idxs.append(idx)
        # TODO(synk): if inputs can legitimately contain -inf (or NaN, which torch.topk
        # treats as largest), reinstate an explicit not-yet-selected mask here.

        # --- Restore original time order: rank each picked index among the k picks
        # (all distinct -> a permutation), then emit values by rank. (bt,1,H) math only.
        ranks = []
        for p in range(k):
            r = jnp.zeros_like(idxs[p])
            for q in range(k):
                if q != p:
                    r = r + (idxs[q] < idxs[p]).astype(jnp.int32)
            ranks.append(r)

        rows = []
        for j in range(k):
            row = jnp.where(ranks[0] == j, vals[0], 0)
            for p in range(1, k):
                row = row + jnp.where(ranks[p] == j, vals[p], 0)
            rows.append(row)
        out = jnp.concatenate(rows, axis=1)                                     # (sub_bt,k,H)
        o_ref[pl.ds(start, sub_bt)] = out.astype(o_ref.dtype)

    if n_chunks == 1:
        process(0)
    else:
        def body(i, carry):
            process(pl.multiple_of(i * sub_bt, sub_bt))
            return carry
        lax.fori_loop(0, n_chunks, body, 0, unroll=(n_chunks <= 4))


def kmax_pooling_pallas(x, k=K):
    """k-max pooling along dim=1 of x:(B, T, H), preserving original order."""
    # TODO(synk): kernel is specialized for dim=1 of a (B, T, H) tensor (the
    # usage in clf_gru.py); other dims/ranks need a wrapper-side moveaxis.
    B, T, H = x.shape
    assert T >= k, "k-max pooling needs T >= k (torch.topk would raise too)"

    if np.dtype(x.dtype) in (np.dtype(jnp.float32), np.dtype(jnp.bfloat16)):
        cmp_dtype = x.dtype          # native bf16 math on v6e/v7x
    else:
        cmp_dtype = jnp.float32      # TODO(synk): integer inputs exact only up to 2**24

    bt, sub_bt = _choose_blocks(B, T, H,
                                np.dtype(x.dtype).itemsize,
                                np.dtype(cmp_dtype).itemsize)

    return pl.pallas_call(
        functools.partial(_kmax_kernel, k=k, sub_bt=sub_bt, cmp_dtype=cmp_dtype),
        out_shape=jax.ShapeDtypeStruct((B, k, H), x.dtype),
        grid_spec=pltpu.PrefetchScalarGridSpec(
            num_scalar_prefetch=0,
            grid=(pl.cdiv(B, bt),),
            in_specs=[pl.BlockSpec((bt, T, H), lambda b: (b, 0, 0))],
            out_specs=pl.BlockSpec((bt, k, H), lambda b: (b, 0, 0)),
        ),
        compiler_params=pltpu.CompilerParams(
            dimension_semantics=("parallel",),
            vmem_limit_bytes=32 << 20,
        ),
    )(x)


def kmax_pooling_ref(x, k, dim):
    # Pure-JAX reference reproducing the PyTorch semantics exactly.
    xm = jnp.moveaxis(x, dim, -1)
    _, idx = jax.lax.top_k(xm, k)
    idx = jnp.sort(idx, axis=-1)
    out = jnp.take_along_axis(xm, idx, axis=-1)
    return jnp.moveaxis(out, -1, dim)


if __name__ == "__main__":
    key = jax.random.PRNGKey(0)
    B, T, H = 8, 16, 128          # small; H lane-dense; grid = 2 blocks (v7x-friendly)
    x = jax.random.normal(key, (B, T, H), dtype=jnp.float32)

    out = jax.block_until_ready(kmax_pooling_pallas(x, K))

    ref = kmax_pooling_ref(x, K, dim=1)
    assert out.shape == (B, K, H)
    assert jnp.allclose(out, ref), "Pallas k-max pooling mismatch vs reference"

    print("KERNEL_OK")
</pallas_src>

<mosaic_0001>
module attributes {stable_mosaic.version = 11 : i64} {
  func.func @_kmax_kernel(%arg0: i32, %arg1: memref<4x16x128xf32, #tpu.memory_space<vmem>>, %arg2: memref<4x3x128xf32, #tpu.memory_space<vmem>>) attributes {dimension_semantics = [#tpu.dimension_semantics<parallel>], iteration_bounds = array<i64: 2>, scalar_prefetch = 0 : i64, scratch_operands = 0 : i64, tpu.core_type = #tpu.core_type<tc>, window_params = [{transform_indices = @transform_0, window_bounds = array<i64: 4, 16, 128>}, {transform_indices = @transform_1, window_bounds = array<i64: 4, 3, 128>}]} {
    %0 = tpu.iota {dimensions = array<i32: 1>} : vector<4x16x128xi32>
    %c0 = arith.constant 0 : index
    %c0_0 = arith.constant 0 : index
    %c0_1 = arith.constant 0 : index
    %1 = vector.load %arg1[%c0, %c0_0, %c0_1] : memref<4x16x128xf32, #tpu.memory_space<vmem>>, vector<4x16x128xf32>
    %cst = arith.constant dense<0xFF800000> : vector<4x128xf32>
    %2 = vector.multi_reduction <maximumf>, %1, %cst [1] : vector<4x16x128xf32> to vector<4x128xf32>
    %3 = vector.shape_cast %2 : vector<4x128xf32> to vector<4x1x128xf32>
    %4 = vector.broadcast %3 : vector<4x1x128xf32> to vector<4x16x128xf32>
    %5 = arith.cmpf oeq, %1, %4 : vector<4x16x128xf32>
    %c16_i32 = arith.constant 16 : i32
    %6 = vector.broadcast %c16_i32 : i32 to vector<4x16x128xi32>
    %7 = arith.select %5, %0, %6 : vector<4x16x128xi1>, vector<4x16x128xi32>
    %cst_2 = arith.constant dense<2147483647> : vector<4x128xi32>
    %8 = vector.multi_reduction <minsi>, %7, %cst_2 [1] : vector<4x16x128xi32> to vector<4x128xi32>
    %9 = vector.shape_cast %8 : vector<4x128xi32> to vector<4x1x128xi32>
    %10 = vector.broadcast %9 : vector<4x1x128xi32> to vector<4x16x128xi32>
    %11 = arith.cmpi eq, %0, %10 : vector<4x16x128xi32>
    %cst_3 = arith.constant 0xFF800000 : f32
    %12 = vector.broadcast %cst_3 : f32 to vector<4x16x128xf32>
    %13 = arith.select %11, %12, %1 : vector<4x16x128xi1>, vector<4x16x128xf32>
    %cst_4 = arith.constant dense<0xFF800000> : vector<4x128xf32>
    %14 = vector.multi_reduction <maximumf>, %13, %cst_4 [1] : vector<4x16x128xf32> to vector<4x128xf32>
    %15 = vector.shape_cast %14 : vector<4x128xf32> to vector<4x1x128xf32>
    %16 = vector.broadcast %15 : vector<4x1x128xf32> to vector<4x16x128xf32>
    %17 = arith.cmpf oeq, %13, %16 : vector<4x16x128xf32>
    %c16_i32_5 = arith.constant 16 : i32
    %18 = vector.broadcast %c16_i32_5 : i32 to vector<4x16x128xi32>
    %19 = arith.select %17, %0, %18 : vector<4x16x128xi1>, vector<4x16x128xi32>
    %cst_6 = arith.constant dense<2147483647> : vector<4x128xi32>
    %20 = vector.multi_reduction <minsi>, %19, %cst_6 [1] : vector<4x16x128xi32> to vector<4x128xi32>
    %21 = vector.shape_cast %20 : vector<4x128xi32> to vector<4x1x128xi32>
    %22 = vector.broadcast %21 : vector<4x1x128xi32> to vector<4x16x128xi32>
    %23 = arith.cmpi eq, %0, %22 : vector<4x16x128xi32>
    %cst_7 = arith.constant 0xFF800000 : f32
    %24 = vector.broadcast %cst_7 : f32 to vector<4x16x128xf32>
    %25 = arith.select %23, %24, %13 : vector<4x16x128xi1>, vector<4x16x128xf32>
    %cst_8 = arith.constant dense<0xFF800000> : vector<4x128xf32>
    %26 = vector.multi_reduction <maximumf>, %25, %cst_8 [1] : vector<4x16x128xf32> to vector<4x128xf32>
    %27 = vector.shape_cast %26 : vector<4x128xf32> to vector<4x1x128xf32>
    %28 = vector.broadcast %27 : vector<4x1x128xf32> to vector<4x16x128xf32>
    %29 = arith.cmpf oeq, %25, %28 : vector<4x16x128xf32>
    %c16_i32_9 = arith.constant 16 : i32
    %30 = vector.broadcast %c16_i32_9 : i32 to vector<4x16x128xi32>
    %31 = arith.select %29, %0, %30 : vector<4x16x128xi1>, vector<4x16x128xi32>
    %cst_10 = arith.constant dense<2147483647> : vector<4x128xi32>
    %32 = vector.multi_reduction <minsi>, %31, %cst_10 [1] : vector<4x16x128xi32> to vector<4x128xi32>
    %33 = vector.shape_cast %32 : vector<4x128xi32> to vector<4x1x128xi32>
    %c0_i32 = arith.constant 0 : i32
    %34 = vector.broadcast %c0_i32 : i32 to vector<4x1x128xi32>
    %35 = arith.cmpi slt, %21, %9 : vector<4x1x128xi32>
    %36 = arith.extui %35 : vector<4x1x128xi1> to vector<4x1x128xi32>
    %37 = arith.addi %34, %36 : vector<4x1x128xi32>
    %38 = arith.cmpi slt, %33, %9 : vector<4x1x128xi32>
    %39 = arith.extui %38 : vector<4x1x128xi1> to vector<4x1x128xi32>
    %40 = arith.addi %37, %39 : vector<4x1x128xi32>
    %c0_i32_11 = arith.constant 0 : i32
    %41 = vector.broadcast %c0_i32_11 : i32 to vector<4x1x128xi32>
    %42 = arith.cmpi slt, %9, %21 : vector<4x1x128xi32>
    %43 = arith.extui %42 : vector<4x1x128xi1> to vector<4x1x128xi32>
    %44 = arith.addi %41, %43 : vector<4x1x128xi32>
    %45 = arith.cmpi slt, %33, %21 : vector<4x1x128xi32>
    %46 = arith.extui %45 : vector<4x1x128xi1> to vector<4x1x128xi32>
    %47 = arith.addi %44, %46 : vector<4x1x128xi32>
    %c0_i32_12 = arith.constant 0 : i32
    %48 = vector.broadcast %c0_i32_12 : i32 to vector<4x1x128xi32>
    %49 = arith.cmpi slt, %9, %33 : vector<4x1x128xi32>
    %50 = arith.extui %49 : vector<4x1x128xi1> to vector<4x1x128xi32>
    %51 = arith.addi %48, %50 : vector<4x1x128xi32>
    %52 = arith.cmpi slt, %21, %33 : vector<4x1x128xi32>
    %53 = arith.extui %52 : vector<4x1x128xi1> to vector<4x1x128xi32>
    %54 = arith.addi %51, %53 : vector<4x1x128xi32>
    %c0_i32_13 = arith.constant 0 : i32
    %55 = vector.broadcast %c0_i32_13 : i32 to vector<4x1x128xi32>
    %56 = arith.cmpi eq, %40, %55 : vector<4x1x128xi32>
    %c0_i32_14 = arith.constant 0 : i32
    %57 = arith.sitofp %c0_i32_14 : i32 to f32
    %58 = vector.broadcast %57 : f32 to vector<4x1x128xf32>
    %59 = arith.select %56, %3, %58 : vector<4x1x128xi1>, vector<4x1x128xf32>
    %c0_i32_15 = arith.constant 0 : i32
    %60 = vector.broadcast %c0_i32_15 : i32 to vector<4x1x128xi32>
    %61 = arith.cmpi eq, %47, %60 : vector<4x1x128xi32>
    %c0_i32_16 = arith.constant 0 : i32
    %62 = arith.sitofp %c0_i32_16 : i32 to f32
    %63 = vector.broadcast %62 : f32 to vector<4x1x128xf32>
    %64 = arith.select %61, %15, %63 : vector<4x1x128xi1>, vector<4x1x128xf32>
    %65 = arith.addf %59, %64 : vector<4x1x128xf32>
    %c0_i32_17 = arith.constant 0 : i32
    %66 = vector.broadcast %c0_i32_17 : i32 to vector<4x1x128xi32>
    %67 = arith.cmpi eq, %54, %66 : vector<4x1x128xi32>
    %c0_i32_18 = arith.constant 0 : i32
    %68 = arith.sitofp %c0_i32_18 : i32 to f32
    %69 = vector.broadcast %68 : f32 to vector<4x1x128xf32>
    %70 = arith.select %67, %27, %69 : vector<4x1x128xi1>, vector<4x1x128xf32>
    %71 = arith.addf %65, %70 : vector<4x1x128xf32>
    %c1_i32 = arith.constant 1 : i32
    %72 = vector.broadcast %c1_i32 : i32 to vector<4x1x128xi32>
    %73 = arith.cmpi eq, %40, %72 : vector<4x1x128xi32>
    %c0_i32_19 = arith.constant 0 : i32
    %74 = arith.sitofp %c0_i32_19 : i32 to f32
    %75 = vector.broadcast %74 : f32 to vector<4x1x128xf32>
    %76 = arith.select %73, %3, %75 : vector<4x1x128xi1>, vector<4x1x128xf32>
    %c1_i32_20 = arith.constant 1 : i32
    %77 = vector.broadcast %c1_i32_20 : i32 to vector<4x1x128xi32>
    %78 = arith.cmpi eq, %47, %77 : vector<4x1x128xi32>
    %c0_i32_21 = arith.constant 0 : i32
    %79 = arith.sitofp %c0_i32_21 : i32 to f32
    %80 = vector.broadcast %79 : f32 to vector<4x1x128xf32>
    %81 = arith.select %78, %15, %80 : vector<4x1x128xi1>, vector<4x1x128xf32>
    %82 = arith.addf %76, %81 : vector<4x1x128xf32>
    %c1_i32_22 = arith.constant 1 : i32
    %83 = vector.broadcast %c1_i32_22 : i32 to vector<4x1x128xi32>
    %84 = arith.cmpi eq, %54, %83 : vector<4x1x128xi32>
    %c0_i32_23 = arith.constant 0 : i32
    %85 = arith.sitofp %c0_i32_23 : i32 to f32
    %86 = vector.broadcast %85 : f32 to vector<4x1x128xf32>
    %87 = arith.select %84, %27, %86 : vector<4x1x128xi1>, vector<4x1x128xf32>
    %88 = arith.addf %82, %87 : vector<4x1x128xf32>
    %c2_i32 = arith.constant 2 : i32
    %89 = vector.broadcast %c2_i32 : i32 to vector<4x1x128xi32>
    %90 = arith.cmpi eq, %40, %89 : vector<4x1x128xi32>
    %c0_i32_24 = arith.constant 0 : i32
    %91 = arith.sitofp %c0_i32_24 : i32 to f32
    %92 = vector.broadcast %91 : f32 to vector<4x1x128xf32>
    %93 = arith.select %90, %3, %92 : vector<4x1x128xi1>, vector<4x1x128xf32>
    %c2_i32_25 = arith.constant 2 : i32
    %94 = vector.broadcast %c2_i32_25 : i32 to vector<4x1x128xi32>
    %95 = arith.cmpi eq, %47, %94 : vector<4x1x128xi32>
    %c0_i32_26 = arith.constant 0 : i32
    %96 = arith.sitofp %c0_i32_26 : i32 to f32
    %97 = vector.broadcast %96 : f32 to vector<4x1x128xf32>
    %98 = arith.select %95, %15, %97 : vector<4x1x128xi1>, vector<4x1x128xf32>
    %99 = arith.addf %93, %98 : vector<4x1x128xf32>
    %c2_i32_27 = arith.constant 2 : i32
    %100 = vector.broadcast %c2_i32_27 : i32 to vector<4x1x128xi32>
    %101 = arith.cmpi eq, %54, %100 : vector<4x1x128xi32>
    %c0_i32_28 = arith.constant 0 : i32
    %102 = arith.sitofp %c0_i32_28 : i32 to f32
    %103 = vector.broadcast %102 : f32 to vector<4x1x128xf32>
    %104 = arith.select %101, %27, %103 : vector<4x1x128xi1>, vector<4x1x128xf32>
    %105 = arith.addf %99, %104 : vector<4x1x128xf32>
    %106 = tpu.concatenate %71, %88, %105 in 1 : vector<4x1x128xf32>, vector<4x1x128xf32>, vector<4x1x128xf32> -> vector<4x3x128xf32>
    %c0_29 = arith.constant 0 : index
    %c0_30 = arith.constant 0 : index
    %c0_31 = arith.constant 0 : index
    %107 = vector.load %arg2[%c0_29, %c0_30, %c0_31] : memref<4x3x128xf32, #tpu.memory_space<vmem>>, vector<4x3x128xf32>
    tpu.vector_store %arg2[%c0_29, %c0_30, %c0_31], %106 {strides = array<i32>} : memref<4x3x128xf32, #tpu.memory_space<vmem>>, vector<4x3x128xf32>,
    return
  }
  func.func @transform_0(%arg0: i32) -> (i32, i32, i32) {
    %c0_i32 = arith.constant 0 : i32
    %c0_i32_0 = arith.constant 0 : i32
    %c0_i32_1 = arith.constant 0 : i32
    return %arg0, %c0_i32, %c0_i32_0 : i32, i32, i32
  }
  func.func @transform_1(%arg0: i32) -> (i32, i32, i32) {
    %c0_i32 = arith.constant 0 : i32
    %c0_i32_0 = arith.constant 0 : i32
    %c0_i32_1 = arith.constant 0 : i32
    return %arg0, %c0_i32, %c0_i32_0 : i32, i32, i32
  }
}

</mosaic_0001>

<bundles_post_ra>
// kernel: tpu_custom_call.1
= control target key start
LH: loop header
LB: loop body
LE: loop exit
PB: predicated region body
PF: predicated region fallthrough
CT: control target
= control target key end

     0   :  { %6 = vsyncpa [#allocation3], 0  ;;  %s1339_s0 = inlined_call_operand.hbm [shape: f32[8,16,128], index: 0, kind: input, shape index: {}]   ;;  %s1340_s1 = inlined_call_operand.vmem [shape: f32[8,3,128], index: 1, kind: output, shape index: {}]  }
   0x1   :  { %8 = vsyncpa [#allocation3 + $0x1], 0  ;;  %s822_s6 = smov 0   ;;  %s824_s7 = smov 0  }
   0x2   :  { %s826_s8 = smov 0   ;;  %s828_s9 = smov 0  }
   0x3 LB: > { %s684_s10 = sadd.s32 4294967295, %s806_s9   ;;  %s842_s11 = sadd.s32 1, %s806_s9   ;;  %s806_s9 = sphi %s828_s9, %s1347_s9   ;;  %s802_s8 = sphi %s826_s8, %s1346_s8   ;;  %s798_s7 = sphi %s824_s7, %s1345_s7   ;;  %s794_s6 = sphi %s822_s6, %s1344_s6  }
   0x4   : > { %s18_s12 = ssub.s32 %s806_s9, %s842_s11  ;;  %s21_s13 = sadd.s32 1, %s802_s8 }
   0x5   : > { %p19_p0 = scmp.eq.s32.totalorder %s18_s12, 0  ;;  %p28_p1 = scmp.ne.s32.totalorder %s802_s8, %s798_s7 }
   0x6   : > { %p29_p2 = scmp.eq.s32.totalorder %s806_s9, 0  ;;  %p34_p3 = scmp.ne.s32.totalorder %s798_s7, %s794_s6 }
   0x7   : > { %s852_s14 = scalar_select %p19_p0, %s802_s8, %s21_s13  }
   0x8   : > { %p30_p4 = por %p29_p2, %p28_p1  ;;  %p35_p5 = scmp.eq.s32.totalorder %s684_s10, 0 }
   0x9   : > { %p706_p6 = scmp.lt.s32.totalorder %s806_s9, 2  ;;  %s84_s16 = sand.u32 1, %s802_s8  }
   0xa   : > { %p857_p7 = por %p35_p5, %p34_p3  ;;  %s688_s17 = sshll.u32 %s84_s16, 6 }
   0xb   : > { %s699_s18 = sshll.u32 %s806_s9, 10  ;;  %s88_s22 = scalar_lea.vmem [#allocation2], %s688_s17 }
   0xc   : > { %s866_s21 = scalar_lea.hbm %s1339_s0, %s699_s18  ;;  %s96_s23 = sshll.u32 %s88_s22, 4  ;;  %s868_s23 = int_to_ptr.vmem [resolvable:$true] %s96_s23 }
   0xd   : > { %p870_p8 = pnand %p706_p6, %p30_p4  ;;  %s875_s25 = scalar_lea.sflag [#allocation3], %s84_s16 }
   0xe   : > { %s742_s26 = scalar_lea.hbm %s866_s21, 1024  ;;  %s747_s29 = scalar_lea.hbm %s1339_s0, 2048 }
   0xf   : > { %p743_p10 = scmp.ne.s32.totalorder %s866_s21, %s742_s26  ;;  %p744_p11 = pneg %p870_p8 }
  0x10   : > { %p748_p0 = scmp.lt.u32.totalorder %s866_s21, %s1339_s0  ;;  %p749_p1 = scmp.lt.u32.totalorder %s747_s29, %s742_s26 }
  0x11   : > { %p745_p12 = pnand %p744_p11, %p743_p10  ;;  %p751_p3 = scmp.lt.u32.totalorder %s742_s26, %s866_s21 }
  0x12   : > { %p750_p2 = por %p749_p1, %p748_p0 }
  0x13   : > { %p746_p13 = pneg %p745_p12 }
  0x14   : > { %p752_p4 = por %p751_p3, %p750_p2 }
  0x16   : > { %p753_p5 = pnand %p752_p4, %p746_p13 }
  0x18   : > { %756 = shalt.err (!%p753_p5)
}
  0x19   : > { %s757_s3 = scalar_lea.vmem %s868_s23, 1024  ;;  %s808_s4 = smov [#allocation2]  }
  0x1a   : > { %p758_p6 = scmp.ne.s32.totalorder %s868_s23, %s757_s3  ;;  %s762_s5 = sshll.u32 %s808_s4, 4  ;;  %s763_s5 = int_to_ptr.vmem [resolvable:$false] %s762_s5 }
  0x1b   : > { %s764_s6 = scalar_lea.vmem %s763_s5, 2048  ;;  %p765_p9 = scmp.lt.s32.totalorder %s868_s23, %s763_s5 }
  0x1c   : > { %p760_p10 = pnand %p758_p6, %p744_p11  ;;  %p766_p0 = scmp.lt.s32.totalorder %s764_s6, %s757_s3 }
  0x1e   : > { %p761_p12 = pneg %p760_p10  ;;  %p767_p1 = por %p766_p0, %p765_p9 }
  0x20   : > { %p768_p2 = pnand %p767_p1, %p761_p12 }
  0x22   : > { %771 = shalt.err (!%p768_p2)
}
  0x23   : > { %s809_s12 = smov 128   ;;  %s810_s13 = smov 8  }
  0x24   : > { %705 = dma.hbm_to_vmem [thread:$0]  (!%p870_p8), %s866_s21, 1024, %s868_s23, %s875_s25, %s809_s12, %s809_s12, %s810_s13  }
  0x25   : > { %p104_p11 = scmp.lt.s32.totalorder %s806_s9, 3  ;;  %p1343_p13 = scmp.ge.s32.totalorder %s806_s9, 1 }
  0x27   : > { %p105_p3 = pnand %p1343_p13, %p104_p11 }
  0x28   : > { %s110_s16 = sand.u32 (!%p105_p3), 1, %s798_s7  }
  0x29   : > { %108 = sbr.rel (%p105_p3) target bundleno = 194 (0xc2), region = 24  ;;  %s693_s17 = sshll.u32 (!%p105_p3), %s110_s16, 6 }
  0x2a   : > { %s111_s18 = scalar_lea.sflag (!%p105_p3), [#allocation3], %s110_s16  ;;  %s114_s19 = scalar_lea.vmem (!%p105_p3), [#allocation2], %s693_s17 }
  0x30   : > { %789 = dma.done.wait (%p857_p7), %s111_s18, 1024  }
  0x31   : > { %791 = vsyncadd (%p857_p7), %s111_s18, 4294966272  ;;  %v911_v0 = vld [vmem:[%s114_s19] sm:$0xff]  ;;  %v913_v1 = vld [vmem:[%s114_s19 + $0x8] sm:$0xff]  ;;  %v140_v15 = vlaneseq  ;;  %s1258_s15 = sshll.u32 %s684_s10, 2 }
  0x32   : > { %v915_v2 = vld [vmem:[%s114_s19 + $0x10] sm:$0xff]  ;;  %v917_v3 = vld [vmem:[%s114_s19 + $0x18] sm:$0xff]  ;;  %v919_v4 = vld [vmem:[%s114_s19 + $0x20] sm:$0xff]  ;;  %v151_v6 = vmax.f32 %v911_v0, %v913_v1  ;;  %p135_p7 = scmp.lt.s32.totalorder %s1258_s15, 7 }
  0x33   : > { %v921_v5 = vld [vmem:[%s114_s19 + $0x28] sm:$0xff]  ;;  %v925_v7 = vld [vmem:[%s114_s19 + $0x30] sm:$0xff]  ;;  %v927_v8 = vld [vmem:[%s114_s19 + $0x38] sm:$0xff]  ;;  %v158_v9 = vmax.f32 %v915_v2, %v917_v3  ;;  %v935_v24 = vshrl.u32 %v140_v15, 7 }
  0x34   : > { %v165_v10 = vmax.f32 %v919_v4, %v921_v5  ;;  %v152_v11 = vrot.slane %v151_v6, 4  ;;  %v172_v12 = vmax.f32 %v925_v7, %v927_v8  ;;  %s1349_s15 = smov (!%p135_p7, %s1258_s15), 7 }
  0x35   : > { %v159_v13 = vrot.slane %v158_v9, 4  ;;  %v938_v33 = vadd.s32 8, %v935_v24  ;;  %s695_s9 = sshll.u32 %s1349_s15, 2 }
  0x36   : > { %v166_v14 = vrot.slane %v165_v10, 4  ;;  %v153_v16 = vmax.f32 %v151_v6, %v152_v11  ;;  %v173_v17 = vrot.slane %v172_v12, 4  ;;  %s138_s21 = scalar_lea.vmem %s1340_s1, %s695_s9 }
  0x37   : > { %v160_v18 = vmax.f32 %v158_v9, %v159_v13 }
  0x38   : > { %v167_v19 = vmax.f32 %v165_v10, %v166_v14  ;;  %v154_v20 = vrot.slane %v153_v16, 2  ;;  %v174_v21 = vmax.f32 %v172_v12, %v173_v17 }
  0x39   : > { %v161_v22 = vrot.slane %v160_v18, 2 }
  0x3a   : > { %v168_v23 = vrot.slane %v167_v19, 2  ;;  %v155_v25 = vmax.f32 %v153_v16, %v154_v20  ;;  %v175_v26 = vrot.slane %v174_v21, 2 }
  0x3b   : > { %v162_v27 = vmax.f32 %v160_v18, %v161_v22 }
  0x3c   : > { %v169_v28 = vmax.f32 %v167_v19, %v168_v23  ;;  %v156_v29 = vrot.slane %v155_v25, 1  ;;  %v176_v30 = vmax.f32 %v174_v21, %v175_v26 }
  0x3d   : > { %v163_v31 = vrot.slane %v162_v27, 1 }
  0x3e   : > { %v170_v32 = vrot.slane %v169_v28, 1  ;;  %v940_v34 = vmax.f32 %v155_v25, %v156_v29  ;;  %v177_v35 = vrot.slane %v176_v30, 1 }
  0x3f   : > { %v942_v36 = vmax.f32 %v162_v27, %v163_v31 }
  0x40   : > { %v944_v37 = vmax.f32 %v169_v28, %v170_v32  ;;  %v946_v38 = vmax.f32 %v176_v30, %v177_v35  ;;  %vm179_vm0 = vcmp.eq.f32.partialorder %v911_v0, %v940_v34  ;;  %vm180_vm1 = vcmp.eq.f32.partialorder %v913_v1, %v940_v34 }
  0x41   : > { %vm181_vm2 = vcmp.eq.f32.partialorder %v915_v2, %v942_v36  ;;  %vm182_vm3 = vcmp.eq.f32.partialorder %v917_v3, %v942_v36  ;;  %v187_v39 = vsel %vm179_vm0, %v935_v24, 16  ;;  %v188_v40 = vsel %vm180_vm1, %v938_v33, 16 }
  0x42   : > { %vm183_vm4 = vcmp.eq.f32.partialorder %v919_v4, %v944_v37  ;;  %vm184_vm5 = vcmp.eq.f32.partialorder %v921_v5, %v944_v37  ;;  %vm185_vm6 = vcmp.eq.f32.partialorder %v925_v7, %v946_v38  ;;  %vm186_vm7 = vcmp.eq.f32.partialorder %v927_v8, %v946_v38 }
  0x43   : > { %v189_v41 = vsel %vm181_vm2, %v935_v24, 16  ;;  %v190_v42 = vsel %vm182_vm3, %v938_v33, 16  ;;  %v191_v43 = vsel %vm183_vm4, %v935_v24, 16  ;;  %v192_v44 = vsel %vm184_vm5, %v938_v33, 16 }
  0x44   : > { %v193_v45 = vsel %vm185_vm6, %v935_v24, 16  ;;  %v194_v46 = vsel %vm186_vm7, %v938_v33, 16  ;;  %vm195_vm8 = vcmp.lt.s32.totalorder %v187_v39, %v188_v40  ;;  %vm206_vm9 = vcmp.lt.s32.totalorder %v189_v41, %v190_v42 }
  0x45   : > { %v196_v47 = vsel %vm195_vm8, %v187_v39, %v188_v40  ;;  %v207_v48 = vsel %vm206_vm9, %v189_v41, %v190_v42  ;;  %vm217_vm10 = vcmp.lt.s32.totalorder %v191_v43, %v192_v44  ;;  %vm228_vm11 = vcmp.lt.s32.totalorder %v193_v45, %v194_v46 }
  0x46   : > { %v197_v49 = vrot.slane %v196_v47, 4  ;;  %v208_v50 = vrot.slane %v207_v48, 4  ;;  %v218_v51 = vsel %vm217_vm10, %v191_v43, %v192_v44  ;;  %v229_v52 = vsel %vm228_vm11, %v193_v45, %v194_v46 }
  0x47   : > { %v219_v53 = vrot.slane %v218_v51, 4  ;;  %v230_v54 = vrot.slane %v229_v52, 4 }
  0x48   : > { %vm198_vm12 = vcmp.lt.s32.totalorder %v196_v47, %v197_v49  ;;  %vm209_vm13 = vcmp.lt.s32.totalorder %v207_v48, %v208_v50 }
  0x49   : > { %v199_v55 = vsel %vm198_vm12, %v196_v47, %v197_v49  ;;  %v210_v56 = vsel %vm209_vm13, %v207_v48, %v208_v50  ;;  %vm220_vm14 = vcmp.lt.s32.totalorder %v218_v51, %v219_v53  ;;  %vm231_vm15 = vcmp.lt.s32.totalorder %v229_v52, %v230_v54 }
  0x4a   : > { %v200_v57 = vrot.slane %v199_v55, 2  ;;  %v211_v58 = vrot.slane %v210_v56, 2  ;;  %v221_v59 = vsel %vm220_vm14, %v218_v51, %v219_v53  ;;  %v232_v60 = vsel %vm231_vm15, %v229_v52, %v230_v54 }
  0x4b   : > { %v222_v61 = vrot.slane %v221_v59, 2  ;;  %v233_v62 = vrot.slane %v232_v60, 2 }
  0x4c   : > { %vm201_vm0 = vcmp.lt.s32.totalorder %v199_v55, %v200_v57  ;;  %vm212_vm1 = vcmp.lt.s32.totalorder %v210_v56, %v211_v58 }
  0x4d   : > { %v202_v63 = vsel %vm201_vm0, %v199_v55, %v200_v57  ;;  %v213_v6 = vsel %vm212_vm1, %v210_v56, %v211_v58  ;;  %vm223_vm2 = vcmp.lt.s32.totalorder %v221_v59, %v222_v61  ;;  %vm234_vm3 = vcmp.lt.s32.totalorder %v232_v60, %v233_v62 }
  0x4e   : > { %v203_v9 = vrot.slane %v202_v63, 1  ;;  %v214_v10 = vrot.slane %v213_v6, 1  ;;  %v224_v11 = vsel %vm223_vm2, %v221_v59, %v222_v61  ;;  %v235_v12 = vsel %vm234_vm3, %v232_v60, %v233_v62 }
  0x4f   : > { %v225_v13 = vrot.slane %v224_v11, 1  ;;  %v236_v14 = vrot.slane %v235_v12, 1 }
  0x50   : > { %vm204_vm4 = vcmp.lt.s32.totalorder %v202_v63, %v203_v9  ;;  %vm215_vm5 = vcmp.lt.s32.totalorder %v213_v6, %v214_v10 }
  0x51   : > { %v972_v15 = vsel %vm204_vm4, %v202_v63, %v203_v9  ;;  %v974_v16 = vsel %vm215_vm5, %v213_v6, %v214_v10  ;;  %vm226_vm6 = vcmp.lt.s32.totalorder %v224_v11, %v225_v13  ;;  %vm237_vm7 = vcmp.lt.s32.totalorder %v235_v12, %v236_v14 }
  0x52   : > { %v976_v17 = vsel %vm226_vm6, %v224_v11, %v225_v13  ;;  %v978_v18 = vsel %vm237_vm7, %v235_v12, %v236_v14  ;;  %vm239_vm8 = vcmp.eq.s32.totalorder %v935_v24, %v972_v15  ;;  %vm240_vm9 = vcmp.eq.s32.totalorder %v938_v33, %v972_v15 }
  0x53   : > { %vm241_vm10 = vcmp.eq.s32.totalorder %v935_v24, %v974_v16  ;;  %vm242_vm11 = vcmp.eq.s32.totalorder %v938_v33, %v974_v16  ;;  %vm243_vm12 = vcmp.eq.s32.totalorder %v935_v24, %v976_v17  ;;  %vm244_vm13 = vcmp.eq.s32.totalorder %v938_v33, %v976_v17 }
  0x54   : > { %vm245_vm14 = vcmp.eq.s32.totalorder %v935_v24, %v978_v18  ;;  %vm246_vm15 = vcmp.eq.s32.totalorder %v938_v33, %v978_v18  ;;  %v997_v19 = vsel %vm239_vm8, -inf, %v911_v0  ;;  %v1000_v20 = vsel %vm240_vm9, -inf, %v913_v1 }
  0x55   : > { %v1003_v21 = vsel %vm241_vm10, -inf, %v915_v2  ;;  %v1006_v22 = vsel %vm242_vm11, -inf, %v917_v3  ;;  %v1009_v23 = vsel %vm243_vm12, -inf, %v919_v4  ;;  %v1012_v25 = vsel %vm244_vm13, -inf, %v921_v5 }
  0x56   : > { %v1015_v26 = vsel %vm245_vm14, -inf, %v925_v7  ;;  %v1018_v0 = vsel %vm246_vm15, -inf, %v927_v8  ;;  %v255_v1 = vmax.f32 %v997_v19, %v1000_v20  ;;  %v262_v2 = vmax.f32 %v1003_v21, %v1006_v22 }
  0x57   : > { %v269_v3 = vmax.f32 %v1009_v23, %v1012_v25  ;;  %v276_v4 = vmax.f32 %v1015_v26, %v1018_v0 }
  0x58   : > { %v256_v5 = vrot.slane %v255_v1, 4  ;;  %v263_v27 = vrot.slane %v262_v2, 4 }
  0x59   : > { %v270_v28 = vrot.slane %v269_v3, 4  ;;  %v277_v7 = vrot.slane %v276_v4, 4 }
  0x5a   : > { %v257_v29 = vmax.f32 %v255_v1, %v256_v5  ;;  %v264_v30 = vmax.f32 %v262_v2, %v263_v27 }
  0x5b   : > { %v271_v8 = vmax.f32 %v269_v3, %v270_v28  ;;  %v278_v31 = vmax.f32 %v276_v4, %v277_v7 }
  0x5c   : > { %v258_v32 = vrot.slane %v257_v29, 2  ;;  %v265_v35 = vrot.slane %v264_v30, 2 }
  0x5d   : > { %v272_v39 = vrot.slane %v271_v8, 2  ;;  %v279_v40 = vrot.slane %v278_v31, 2 }
  0x5e   : > { %v259_v41 = vmax.f32 %v257_v29, %v258_v32  ;;  %v266_v42 = vmax.f32 %v264_v30, %v265_v35 }
  0x5f   : > { %v273_v43 = vmax.f32 %v271_v8, %v272_v39  ;;  %v280_v44 = vmax.f32 %v278_v31, %v279_v40 }
  0x60   : > { %v260_v45 = vrot.slane %v259_v41, 1  ;;  %v267_v46 = vrot.slane %v266_v42, 1 }
  0x61   : > { %v274_v47 = vrot.slane %v273_v43, 1  ;;  %v281_v48 = vrot.slane %v280_v44, 1 }
  0x62   : > { %v1028_v49 = vmax.f32 %v259_v41, %v260_v45  ;;  %v1030_v50 = vmax.f32 %v266_v42, %v267_v46 }
  0x63   : > { %v1032_v51 = vmax.f32 %v273_v43, %v274_v47  ;;  %v1034_v52 = vmax.f32 %v280_v44, %v281_v48 }
  0x64   : > { %vm283_vm0 = vcmp.eq.f32.partialorder %v997_v19, %v1028_v49  ;;  %vm284_vm1 = vcmp.eq.f32.partialorder %v1000_v20, %v1028_v49  ;;  %vm285_vm2 = vcmp.eq.f32.partialorder %v1003_v21, %v1030_v50  ;;  %vm286_vm3 = vcmp.eq.f32.partialorder %v1006_v22, %v1030_v50 }
  0x65   : > { %vm287_vm4 = vcmp.eq.f32.partialorder %v1009_v23, %v1032_v51  ;;  %vm288_vm5 = vcmp.eq.f32.partialorder %v1012_v25, %v1032_v51  ;;  %vm289_vm6 = vcmp.eq.f32.partialorder %v1015_v26, %v1034_v52  ;;  %vm290_vm7 = vcmp.eq.f32.partialorder %v1018_v0, %v1034_v52 }
  0x66   : > { %v291_v53 = vsel %vm283_vm0, %v935_v24, 16  ;;  %v292_v54 = vsel %vm284_vm1, %v938_v33, 16  ;;  %v293_v55 = vsel %vm285_vm2, %v935_v24, 16  ;;  %v294_v56 = vsel %vm286_vm3, %v938_v33, 16 }
  0x67   : > { %v295_v57 = vsel %vm287_vm4, %v935_v24, 16  ;;  %v296_v58 = vsel %vm288_vm5, %v938_v33, 16  ;;  %v297_v59 = vsel %vm289_vm6, %v935_v24, 16  ;;  %v298_v60 = vsel %vm290_vm7, %v938_v33, 16 }
  0x68   : > { %vm299_vm8 = vcmp.lt.s32.totalorder %v291_v53, %v292_v54  ;;  %vm310_vm9 = vcmp.lt.s32.totalorder %v293_v55, %v294_v56  ;;  %vm321_vm10 = vcmp.lt.s32.totalorder %v295_v57, %v296_v58  ;;  %vm332_vm11 = vcmp.lt.s32.totalorder %v297_v59, %v298_v60 }
  0x69   : > { %v300_v61 = vsel %vm299_vm8, %v291_v53, %v292_v54  ;;  %v311_v62 = vsel %vm310_vm9, %v293_v55, %v294_v56  ;;  %v322_v63 = vsel %vm321_vm10, %v295_v57, %v296_v58  ;;  %v333_v6 = vsel %vm332_vm11, %v297_v59, %v298_v60 }
  0x6a   : > { %v301_v9 = vrot.slane %v300_v61, 4  ;;  %v312_v10 = vrot.slane %v311_v62, 4  ;;  %v323_v11 = vrot.slane %v322_v63, 4  ;;  %v334_v12 = vrot.slane %v333_v6, 4 }
  0x6c   : > { %vm302_vm12 = vcmp.lt.s32.totalorder %v300_v61, %v301_v9  ;;  %vm313_vm13 = vcmp.lt.s32.totalorder %v311_v62, %v312_v10  ;;  %vm324_vm14 = vcmp.lt.s32.totalorder %v322_v63, %v323_v11  ;;  %vm335_vm15 = vcmp.lt.s32.totalorder %v333_v6, %v334_v12 }
  0x6d   : > { %v303_v13 = vsel %vm302_vm12, %v300_v61, %v301_v9  ;;  %v314_v14 = vsel %vm313_vm13, %v311_v62, %v312_v10  ;;  %v325_v1 = vsel %vm324_vm14, %v322_v63, %v323_v11  ;;  %v336_v2 = vsel %vm335_vm15, %v333_v6, %v334_v12 }
  0x6e   : > { %v304_v3 = vrot.slane %v303_v13, 2  ;;  %v315_v4 = vrot.slane %v314_v14, 2  ;;  %v326_v5 = vrot.slane %v325_v1, 2  ;;  %v337_v27 = vrot.slane %v336_v2, 2 }
  0x70   : > { %vm305_vm0 = vcmp.lt.s32.totalorder %v303_v13, %v304_v3  ;;  %vm316_vm1 = vcmp.lt.s32.totalorder %v314_v14, %v315_v4  ;;  %vm327_vm2 = vcmp.lt.s32.totalorder %v325_v1, %v326_v5  ;;  %vm338_vm3 = vcmp.lt.s32.totalorder %v336_v2, %v337_v27 }
  0x71   : > { %v306_v28 = vsel %vm305_vm0, %v303_v13, %v304_v3  ;;  %v317_v7 = vsel %vm316_vm1, %v314_v14, %v315_v4  ;;  %v328_v29 = vsel %vm327_vm2, %v325_v1, %v326_v5  ;;  %v339_v30 = vsel %vm338_vm3, %v336_v2, %v337_v27 }
  0x72   : > { %v307_v8 = vrot.slane %v306_v28, 1  ;;  %v318_v31 = vrot.slane %v317_v7, 1  ;;  %v329_v32 = vrot.slane %v328_v29, 1  ;;  %v340_v35 = vrot.slane %v339_v30, 1 }
  0x74   : > { %vm308_vm4 = vcmp.lt.s32.totalorder %v306_v28, %v307_v8  ;;  %vm319_vm5 = vcmp.lt.s32.totalorder %v317_v7, %v318_v31  ;;  %vm330_vm6 = vcmp.lt.s32.totalorder %v328_v29, %v329_v32  ;;  %vm341_vm7 = vcmp.lt.s32.totalorder %v339_v30, %v340_v35 }
  0x75   : > { %v1060_v39 = vsel %vm308_vm4, %v306_v28, %v307_v8  ;;  %v1062_v40 = vsel %vm319_vm5, %v317_v7, %v318_v31  ;;  %v1064_v41 = vsel %vm330_vm6, %v328_v29, %v329_v32  ;;  %v1066_v42 = vsel %vm341_vm7, %v339_v30, %v340_v35 }
  0x76   : > { %vm343_vm8 = vcmp.eq.s32.totalorder %v935_v24, %v1060_v39  ;;  %vm344_vm9 = vcmp.eq.s32.totalorder %v938_v33, %v1060_v39  ;;  %vm345_vm10 = vcmp.eq.s32.totalorder %v935_v24, %v1062_v40  ;;  %vm346_vm11 = vcmp.eq.s32.totalorder %v938_v33, %v1062_v40 }
  0x77   : > { %vm347_vm12 = vcmp.eq.s32.totalorder %v935_v24, %v1064_v41  ;;  %vm348_vm13 = vcmp.eq.s32.totalorder %v938_v33, %v1064_v41  ;;  %vm349_vm14 = vcmp.eq.s32.totalorder %v935_v24, %v1066_v42  ;;  %vm350_vm15 = vcmp.eq.s32.totalorder %v938_v33, %v1066_v42 }
  0x78   : > { %v351_v43 = vsel %vm343_vm8, -inf, %v997_v19  ;;  %v352_v44 = vsel %vm344_vm9, -inf, %v1000_v20  ;;  %v353_v45 = vsel %vm345_vm10, -inf, %v1003_v21  ;;  %v354_v46 = vsel %vm346_vm11, -inf, %v1006_v22 }
  0x79   : > { %v355_v47 = vsel %vm347_vm12, -inf, %v1009_v23  ;;  %v356_v48 = vsel %vm348_vm13, -inf, %v1012_v25  ;;  %v357_v53 = vsel %vm349_vm14, -inf, %v1015_v26  ;;  %v358_v54 = vsel %vm350_vm15, -inf, %v1018_v0 }
  0x7a   : > { %v359_v55 = vmax.f32 %v351_v43, %v352_v44  ;;  %v366_v56 = vmax.f32 %v353_v45, %v354_v46  ;;  %v373_v57 = vmax.f32 %v355_v47, %v356_v48  ;;  %v380_v58 = vmax.f32 %v357_v53, %v358_v54 }
  0x7b   : > { %vm447_vm0 = vcmp.lt.s32.totalorder %v1060_v39, %v972_v15  ;;  %vm448_vm1 = vcmp.lt.s32.totalorder %v1062_v40, %v974_v16  ;;  %vm449_vm2 = vcmp.lt.s32.totalorder %v1064_v41, %v976_v17  ;;  %vm450_vm3 = vcmp.lt.s32.totalorder %v1066_v42, %v978_v18 }
  0x7c   : > { %v360_v59 = vrot.slane %v359_v55, 4  ;;  %v367_v19 = vrot.slane %v366_v56, 4  ;;  %v374_v60 = vrot.slane %v373_v57, 4  ;;  %v381_v20 = vrot.slane %v380_v58, 4 }
  0x7e   : > { %v361_v61 = vmax.f32 %v359_v55, %v360_v59  ;;  %v368_v21 = vmax.f32 %v366_v56, %v367_v19  ;;  %v375_v62 = vmax.f32 %v373_v57, %v374_v60  ;;  %v382_v22 = vmax.f32 %v380_v58, %v381_v20 }
  0x80   : > { %v362_v63 = vrot.slane %v361_v61, 2  ;;  %v369_v23 = vrot.slane %v368_v21, 2  ;;  %v376_v6 = vrot.slane %v375_v62, 2  ;;  %v383_v25 = vrot.slane %v382_v22, 2 }
  0x82   : > { %v363_v9 = vmax.f32 %v361_v61, %v362_v63  ;;  %v370_v26 = vmax.f32 %v368_v21, %v369_v23  ;;  %v377_v10 = vmax.f32 %v375_v62, %v376_v6  ;;  %v384_v0 = vmax.f32 %v382_v22, %v383_v25 }
  0x84   : > { %v364_v11 = vrot.slane %v363_v9, 1  ;;  %v371_v12 = vrot.slane %v370_v26, 1  ;;  %v378_v13 = vrot.slane %v377_v10, 1  ;;  %v385_v14 = vrot.slane %v384_v0, 1 }
  0x86   : > { %v1092_v1 = vmax.f32 %v363_v9, %v364_v11  ;;  %v1094_v2 = vmax.f32 %v370_v26, %v371_v12  ;;  %v1096_v3 = vmax.f32 %v377_v10, %v378_v13  ;;  %v1098_v4 = vmax.f32 %v384_v0, %v385_v14 }
  0x88   : > { %vm387_vm4 = vcmp.eq.f32.partialorder %v351_v43, %v1092_v1  ;;  %vm388_vm5 = vcmp.eq.f32.partialorder %v352_v44, %v1092_v1  ;;  %vm389_vm6 = vcmp.eq.f32.partialorder %v353_v45, %v1094_v2  ;;  %vm390_vm7 = vcmp.eq.f32.partialorder %v354_v46, %v1094_v2 }
  0x89   : > { %vm391_vm8 = vcmp.eq.f32.partialorder %v355_v47, %v1096_v3  ;;  %vm392_vm9 = vcmp.eq.f32.partialorder %v356_v48, %v1096_v3  ;;  %vm393_vm10 = vcmp.eq.f32.partialorder %v357_v53, %v1098_v4  ;;  %vm394_vm11 = vcmp.eq.f32.partialorder %v358_v54, %v1098_v4 }
  0x8a   : > { %v395_v5 = vsel %vm387_vm4, %v935_v24, 16  ;;  %v396_v27 = vsel %vm388_vm5, %v938_v33, 16  ;;  %v397_v28 = vsel %vm389_vm6, %v935_v24, 16  ;;  %v398_v7 = vsel %vm390_vm7, %v938_v33, 16 }
  0x8b   : > { %v399_v29 = vsel %vm391_vm8, %v935_v24, 16  ;;  %v400_v30 = vsel %vm392_vm9, %v938_v33, 16  ;;  %v401_v8 = vsel %vm393_vm10, %v935_v24, 16  ;;  %v402_v31 = vsel %vm394_vm11, %v938_v33, 16 }
  0x8c   : > { %vm403_vm12 = vcmp.lt.s32.totalorder %v395_v5, %v396_v27  ;;  %vm414_vm13 = vcmp.lt.s32.totalorder %v397_v28, %v398_v7  ;;  %vm425_vm14 = vcmp.lt.s32.totalorder %v399_v29, %v400_v30  ;;  %vm436_vm15 = vcmp.lt.s32.totalorder %v401_v8, %v402_v31 }
  0x8d   : > { %v404_v32 = vsel %vm403_vm12, %v395_v5, %v396_v27  ;;  %v415_v35 = vsel %vm414_vm13, %v397_v28, %v398_v7  ;;  %v426_v43 = vsel %vm425_vm14, %v399_v29, %v400_v30  ;;  %v437_v44 = vsel %vm436_vm15, %v401_v8, %v402_v31 }
  0x8e   : > { %v405_v45 = vrot.slane %v404_v32, 4  ;;  %v416_v46 = vrot.slane %v415_v35, 4  ;;  %v427_v47 = vrot.slane %v426_v43, 4  ;;  %v438_v48 = vrot.slane %v437_v44, 4 }
  0x8f   : > { %v811_v53 = vmov 0  }
  0x90   : > { %v451_v24 = vsel %vm447_vm0, 1, %v811_v53  ;;  %v452_v33 = vsel %vm448_vm1, 1, %v811_v53  ;;  %v453_v54 = vsel %vm449_vm2, 1, %v811_v53  ;;  %v454_v55 = vsel %vm450_vm3, 1, %v811_v53 }
  0x91   : > { %vm406_vm4 = vcmp.lt.s32.totalorder %v404_v32, %v405_v45  ;;  %vm417_vm5 = vcmp.lt.s32.totalorder %v415_v35, %v416_v46  ;;  %vm428_vm6 = vcmp.lt.s32.totalorder %v426_v43, %v427_v47  ;;  %vm439_vm7 = vcmp.lt.s32.totalorder %v437_v44, %v438_v48 }
  0x92   : > { %v407_v56 = vsel %vm406_vm4, %v404_v32, %v405_v45  ;;  %v418_v57 = vsel %vm417_vm5, %v415_v35, %v416_v46  ;;  %v429_v58 = vsel %vm428_vm6, %v426_v43, %v427_v47  ;;  %v440_v59 = vsel %vm439_vm7, %v437_v44, %v438_v48 }
  0x93   : > { %v408_v19 = vrot.slane %v407_v56, 2  ;;  %v419_v60 = vrot.slane %v418_v57, 2  ;;  %v430_v20 = vrot.slane %v429_v58, 2  ;;  %v441_v61 = vrot.slane %v440_v59, 2 }
  0x94   : > { %vm467_vm0 = vcmp.lt.s32.totalorder %v972_v15, %v1060_v39  ;;  %vm468_vm1 = vcmp.lt.s32.totalorder %v974_v16, %v1062_v40  ;;  %vm469_vm2 = vcmp.lt.s32.totalorder %v976_v17, %v1064_v41  ;;  %vm470_vm3 = vcmp.lt.s32.totalorder %v978_v18, %v1066_v42 }
  0x95   : > { %vm409_vm8 = vcmp.lt.s32.totalorder %v407_v56, %v408_v19  ;;  %vm420_vm9 = vcmp.lt.s32.totalorder %v418_v57, %v419_v60  ;;  %vm431_vm10 = vcmp.lt.s32.totalorder %v429_v58, %v430_v20  ;;  %vm442_vm11 = vcmp.lt.s32.totalorder %v440_v59, %v441_v61 }
  0x96   : > { %v410_v21 = vsel %vm409_vm8, %v407_v56, %v408_v19  ;;  %v421_v62 = vsel %vm420_vm9, %v418_v57, %v419_v60  ;;  %v432_v22 = vsel %vm431_vm10, %v429_v58, %v430_v20  ;;  %v443_v63 = vsel %vm442_vm11, %v440_v59, %v441_v61 }
  0x97   : > { %v411_v23 = vrot.slane %v410_v21, 1  ;;  %v422_v6 = vrot.slane %v421_v62, 1  ;;  %v433_v25 = vrot.slane %v432_v22, 1  ;;  %v444_v9 = vrot.slane %v443_v63, 1 }
  0x98   : > { %v471_v26 = vsel %vm467_vm0, 1, %v811_v53  ;;  %v472_v10 = vsel %vm468_vm1, 1, %v811_v53  ;;  %v473_v0 = vsel %vm469_vm2, 1, %v811_v53  ;;  %v474_v11 = vsel %vm470_vm3, 1, %v811_v53 }
  0x99   : > { %vm412_vm12 = vcmp.lt.s32.totalorder %v410_v21, %v411_v23  ;;  %vm423_vm13 = vcmp.lt.s32.totalorder %v421_v62, %v422_v6  ;;  %vm434_vm14 = vcmp.lt.s32.totalorder %v432_v22, %v433_v25  ;;  %vm445_vm15 = vcmp.lt.s32.totalorder %v443_v63, %v444_v9 }
  0x9a   : > { %v413_v12 = vsel %vm412_vm12, %v410_v21, %v411_v23  ;;  %v424_v13 = vsel %vm423_vm13, %v421_v62, %v422_v6  ;;  %v435_v14 = vsel %vm434_vm14, %v432_v22, %v433_v25  ;;  %v446_v5 = vsel %vm445_vm15, %v443_v63, %v444_v9 }
  0x9b   : > { %vm455_vm4 = vcmp.lt.s32.totalorder %v413_v12, %v972_v15  ;;  %vm456_vm5 = vcmp.lt.s32.totalorder %v424_v13, %v974_v16  ;;  %vm457_vm6 = vcmp.lt.s32.totalorder %v435_v14, %v976_v17  ;;  %vm458_vm7 = vcmp.lt.s32.totalorder %v446_v5, %v978_v18 }
  0x9c   : > { %v459_v27 = vsel %vm455_vm4, 1, %v811_v53  ;;  %v460_v28 = vsel %vm456_vm5, 1, %v811_v53  ;;  %v461_v7 = vsel %vm457_vm6, 1, %v811_v53  ;;  %v462_v29 = vsel %vm458_vm7, 1, %v811_v53 }
  0x9d   : > { %v1172_v30 = vadd.s32 %v459_v27, %v451_v24  ;;  %v1174_v8 = vadd.s32 %v460_v28, %v452_v33  ;;  %v1176_v31 = vadd.s32 %v461_v7, %v453_v54  ;;  %v1178_v32 = vadd.s32 %v462_v29, %v454_v55 }
  0x9e   : > { %vm475_vm0 = vcmp.lt.s32.totalorder %v413_v12, %v1060_v39  ;;  %vm476_vm1 = vcmp.lt.s32.totalorder %v424_v13, %v1062_v40  ;;  %vm477_vm2 = vcmp.lt.s32.totalorder %v435_v14, %v1064_v41  ;;  %vm478_vm3 = vcmp.lt.s32.totalorder %v446_v5, %v1066_v42 }
  0x9f   : > { %v479_v35 = vsel %vm475_vm0, 1, %v811_v53  ;;  %v480_v43 = vsel %vm476_vm1, 1, %v811_v53  ;;  %v481_v44 = vsel %vm477_vm2, 1, %v811_v53  ;;  %v482_v45 = vsel %vm478_vm3, 1, %v811_v53 }
  0xa0   : > { %v1188_v46 = vadd.s32 %v479_v35, %v471_v26  ;;  %v1190_v47 = vadd.s32 %v480_v43, %v472_v10  ;;  %v1192_v48 = vadd.s32 %v481_v44, %v473_v0  ;;  %v1194_v24 = vadd.s32 %v482_v45, %v474_v11 }
  0xa1   : > { %vm487_vm8 = vcmp.lt.s32.totalorder %v972_v15, %v413_v12  ;;  %vm488_vm9 = vcmp.lt.s32.totalorder %v974_v16, %v424_v13  ;;  %vm489_vm10 = vcmp.lt.s32.totalorder %v976_v17, %v435_v14  ;;  %vm490_vm11 = vcmp.lt.s32.totalorder %v978_v18, %v446_v5 }
  0xa2   : > { %v491_v33 = vsel %vm487_vm8, 1, %v811_v53  ;;  %v492_v54 = vsel %vm488_vm9, 1, %v811_v53  ;;  %v493_v55 = vsel %vm489_vm10, 1, %v811_v53  ;;  %v494_v56 = vsel %vm490_vm11, 1, %v811_v53 }
  0xa3   : > { %vm495_vm12 = vcmp.lt.s32.totalorder %v1060_v39, %v413_v12  ;;  %vm496_vm13 = vcmp.lt.s32.totalorder %v1062_v40, %v424_v13  ;;  %vm497_vm14 = vcmp.lt.s32.totalorder %v1064_v41, %v435_v14  ;;  %vm498_vm15 = vcmp.lt.s32.totalorder %v1066_v42, %v446_v5 }
  0xa4   : > { %v499_v15 = vsel %vm495_vm12, 1, %v811_v53  ;;  %v500_v16 = vsel %vm496_vm13, 1, %v811_v53  ;;  %v501_v17 = vsel %vm497_vm14, 1, %v811_v53  ;;  %v502_v18 = vsel %vm498_vm15, 1, %v811_v53 }
  0xa5   : > { %v1212_v57 = vadd.s32 %v499_v15, %v491_v33  ;;  %v1214_v58 = vadd.s32 %v500_v16, %v492_v54  ;;  %v1216_v59 = vadd.s32 %v501_v17, %v493_v55  ;;  %v1218_v39 = vadd.s32 %v502_v18, %v494_v56 }
  0xa6   : > { %vm507_vm4 = vcmp.eq.s32.totalorder %v1172_v30, 0  ;;  %vm508_vm5 = vcmp.eq.s32.totalorder %v1174_v8, 0  ;;  %vm509_vm6 = vcmp.eq.s32.totalorder %v1176_v31, 0  ;;  %vm510_vm7 = vcmp.eq.s32.totalorder %v1178_v32, 0 }
  0xa7   : > { %v511_v40 = vsel %vm507_vm4, %v940_v34, 0.0  ;;  %v512_v41 = vsel %vm508_vm5, %v942_v36, 0.0  ;;  %v513_v42 = vsel %vm509_vm6, %v944_v37, 0.0  ;;  %v514_v53 = vsel %vm510_vm7, %v946_v38, 0.0 }
  0xa8   : > { %vm515_vm0 = vcmp.eq.s32.totalorder %v1188_v46, 0  ;;  %vm516_vm1 = vcmp.eq.s32.totalorder %v1190_v47, 0  ;;  %vm517_vm2 = vcmp.eq.s32.totalorder %v1192_v48, 0  ;;  %vm518_vm3 = vcmp.eq.s32.totalorder %v1194_v24, 0 }
  0xa9   : > { %v519_v19 = vsel %vm515_vm0, %v1028_v49, 0.0  ;;  %v520_v60 = vsel %vm516_vm1, %v1030_v50, 0.0  ;;  %v521_v20 = vsel %vm517_vm2, %v1032_v51, 0.0  ;;  %v522_v61 = vsel %vm518_vm3, %v1034_v52, 0.0 }
  0xaa   : > { %v523_v21 = vadd.f32 %v519_v19, %v511_v40  ;;  %v524_v62 = vadd.f32 %v520_v60, %v512_v41  ;;  %v525_v22 = vadd.f32 %v521_v20, %v513_v42  ;;  %v526_v63 = vadd.f32 %v522_v61, %v514_v53 }
  0xab   : > { %vm527_vm8 = vcmp.eq.s32.totalorder %v1212_v57, 0  ;;  %vm528_vm9 = vcmp.eq.s32.totalorder %v1214_v58, 0  ;;  %vm529_vm10 = vcmp.eq.s32.totalorder %v1216_v59, 0  ;;  %vm530_vm11 = vcmp.eq.s32.totalorder %v1218_v39, 0 }
  0xac   : > { %v531_v23 = vsel %vm527_vm8, %v1092_v1, 0.0  ;;  %v532_v6 = vsel %vm528_vm9, %v1094_v2, 0.0  ;;  %v533_v25 = vsel %vm529_vm10, %v1096_v3, 0.0  ;;  %v534_v9 = vsel %vm530_vm11, %v1098_v4, 0.0 }
  0xad   : > { %v1244_v26 = vadd.f32 %v531_v23, %v523_v21  ;;  %v1246_v10 = vadd.f32 %v532_v6, %v524_v62  ;;  %v1248_v0 = vadd.f32 %v533_v25, %v525_v22  ;;  %v1250_v11 = vadd.f32 %v534_v9, %v526_v63 }
  0xae   : > { %vm539_vm12 = vcmp.eq.s32.totalorder %v1172_v30, 1  ;;  %vm540_vm13 = vcmp.eq.s32.totalorder %v1174_v8, 1  ;;  %vm541_vm14 = vcmp.eq.s32.totalorder %v1176_v31, 1  ;;  %vm542_vm15 = vcmp.eq.s32.totalorder %v1178_v32, 1 }
  0xaf   : > { %v543_v12 = vsel %vm539_vm12, %v940_v34, 0.0  ;;  %v544_v13 = vsel %vm540_vm13, %v942_v36, 0.0  ;;  %v545_v14 = vsel %vm541_vm14, %v944_v37, 0.0  ;;  %v546_v5 = vsel %vm542_vm15, %v946_v38, 0.0 }
  0xb0   : > { %vm547_vm4 = vcmp.eq.s32.totalorder %v1188_v46, 1  ;;  %vm548_vm5 = vcmp.eq.s32.totalorder %v1190_v47, 1  ;;  %vm549_vm6 = vcmp.eq.s32.totalorder %v1192_v48, 1  ;;  %vm550_vm7 = vcmp.eq.s32.totalorder %v1194_v24, 1 }
  0xb1   : > { %v551_v27 = vsel %vm547_vm4, %v1028_v49, 0.0  ;;  %v552_v28 = vsel %vm548_vm5, %v1030_v50, 0.0  ;;  %v553_v7 = vsel %vm549_vm6, %v1032_v51, 0.0  ;;  %v554_v29 = vsel %vm550_vm7, %v1034_v52, 0.0 }
  0xb2   : > { %v555_v35 = vadd.f32 %v551_v27, %v543_v12  ;;  %v556_v43 = vadd.f32 %v552_v28, %v544_v13  ;;  %v557_v44 = vadd.f32 %v553_v7, %v545_v14  ;;  %v558_v45 = vadd.f32 %v554_v29, %v546_v5 }
  0xb3   : > { %vm559_vm0 = vcmp.eq.s32.totalorder %v1212_v57, 1  ;;  %vm560_vm1 = vcmp.eq.s32.totalorder %v1214_v58, 1  ;;  %vm561_vm2 = vcmp.eq.s32.totalorder %v1216_v59, 1  ;;  %vm562_vm3 = vcmp.eq.s32.totalorder %v1218_v39, 1 }
  0xb4   : > { %vm603_vm8 = vcmask 1040384   ;;  %v563_v33 = vsel %vm559_vm0, %v1092_v1, 0.0  ;;  %v564_v54 = vsel %vm560_vm1, %v1094_v2, 0.0  ;;  %v565_v55 = vsel %vm561_vm2, %v1096_v3, 0.0 }
  0xb5   : > { %v566_v56 = vsel %vm562_vm3, %v1098_v4, 0.0  ;;  %vm608_vm9 = vcmask 1041408   ;;  %v567_v15 = vadd.f32 %v563_v33, %v555_v35  ;;  %v568_v16 = vadd.f32 %v564_v54, %v556_v43 }
  0xb6   : > { %v569_v17 = vadd.f32 %v565_v55, %v557_v44  ;;  %v570_v18 = vadd.f32 %v566_v56, %v558_v45  ;;  %vm571_vm10 = vcmp.eq.s32.totalorder %v1172_v30, 2  ;;  %vm572_vm11 = vcmp.eq.s32.totalorder %v1174_v8, 2 }
  0xb7   : > { %vm573_vm12 = vcmp.eq.s32.totalorder %v1176_v31, 2  ;;  %vm574_vm13 = vcmp.eq.s32.totalorder %v1178_v32, 2  ;;  %v575_v40 = vsel %vm571_vm10, %v940_v34, 0.0  ;;  %v576_v41 = vsel %vm572_vm11, %v942_v36, 0.0 }
  0xb8   : > { %v577_v42 = vsel %vm573_vm12, %v944_v37, 0.0  ;;  %v578_v53 = vsel %vm574_vm13, %v946_v38, 0.0  ;;  %vm579_vm14 = vcmp.eq.s32.totalorder %v1188_v46, 2  ;;  %vm580_vm15 = vcmp.eq.s32.totalorder %v1190_v47, 2 }
  0xb9   : > { %vm581_vm4 = vcmp.eq.s32.totalorder %v1192_v48, 2  ;;  %vm582_vm5 = vcmp.eq.s32.totalorder %v1194_v24, 2  ;;  %v583_v30 = vsel %vm579_vm14, %v1028_v49, 0.0  ;;  %v584_v8 = vsel %vm580_vm15, %v1030_v50, 0.0 }
  0xba   : > { %v585_v34 = vsel %vm581_vm4, %v1032_v51, 0.0  ;;  %v586_v36 = vsel %vm582_vm5, %v1034_v52, 0.0  ;;  %v587_v37 = vadd.f32 %v583_v30, %v575_v40  ;;  %v588_v31 = vadd.f32 %v584_v8, %v576_v41 }
  0xbb   : > { %v589_v38 = vadd.f32 %v585_v34, %v577_v42  ;;  %v590_v32 = vadd.f32 %v586_v36, %v578_v53  ;;  %vm591_vm6 = vcmp.eq.s32.totalorder %v1212_v57, 2  ;;  %vm592_vm7 = vcmp.eq.s32.totalorder %v1214_v58, 2 }
  0xbc   : > { %vm593_vm0 = vcmp.eq.s32.totalorder %v1216_v59, 2  ;;  %vm594_vm1 = vcmp.eq.s32.totalorder %v1218_v39, 2  ;;  %v595_v49 = vsel %vm591_vm6, %v1092_v1, 0.0  ;;  %v596_v50 = vsel %vm592_vm7, %v1094_v2, 0.0 }
  0xbd   : > { %v597_v51 = vsel %vm593_vm0, %v1096_v3, 0.0  ;;  %v598_v52 = vsel %vm594_vm1, %v1098_v4, 0.0  ;;  %v599_v46 = vadd.f32 %v595_v49, %v587_v37  ;;  %v600_v47 = vadd.f32 %v596_v50, %v588_v31 }
  0xbe   : > { %v601_v48 = vadd.f32 %v597_v51, %v589_v38  ;;  %v602_v24 = vadd.f32 %v598_v52, %v590_v32  ;;  %v604_v57 = vsel %vm603_vm8, %v1244_v26, %v567_v15  ;;  %v605_v1 = vsel %vm603_vm8, %v1246_v10, %v568_v16 }
  0xbf   : > { %v606_v2 = vsel %vm603_vm8, %v1248_v0, %v569_v17  ;;  %v607_v3 = vsel %vm603_vm8, %v1250_v11, %v570_v18  ;;  %v609_v4 = vsel %vm608_vm9, %v604_v57, %v599_v46  ;;  %v610_v58 = vsel %vm608_vm9, %v605_v1, %v600_v47 }
  0xc0   : > { %v611_v59 = vsel %vm608_vm9, %v606_v2, %v601_v48  ;;  %v612_v39 = vsel %vm608_vm9, %v607_v3, %v602_v24  ;;  %613 = vst [vmem:[%s138_s21] sm:$0x7] %v609_v4  ;;  %614 = vst [vmem:[%s138_s21 + $0x4] sm:$0x7] %v610_v58 }
  0xc1   : > { %615 = vst [vmem:[%s138_s21 + $0x8] sm:$0x7] %v611_v59  ;;  %616 = vst [vmem:[%s138_s21 + $0xc] sm:$0x7] %v612_v39 }
  0xc2 PF: > { %p11_p8 = scmp.ge.s32.totalorder %s842_s11, 4   ;;  %s1344_s6 = smov %s798_s7 }
  0xc3   : > { %s1345_s7 = smov %s802_s8  ;;  %s1346_s8 = smov %s852_s14 }
  0xc4   : > { %s1347_s9 = smov %s842_s11  ;;  %13 = sbr.rel (!%p11_p8) target bundleno = 3 (0x3), region = 64 }
  0xcb   :  { %639 = vsyncpa [#allocation3], 1 }
  0xcc   :  { %641 = vsyncpa [#allocation3 + $0x1], 1 }

</bundles_post_ra>
